<compile_context>
chip_gen: v7x
topology: tpu7x:2x2x1
jax: 0.10.0
libtpu: 0.0.40
codegen_flags: <defaults>
</compile_context>

<pallas_src>
import math
import functools

import jax
import jax.numpy as jnp
from jax.experimental import pallas as pl
from jax.experimental.pallas import tpu as pltpu


def _mha_kernel(q_ref, k_ref, v_ref,
                wqkv_ref, bqkv_ref, wo_ref, bo_ref,
                out_ref, probs_ref,
                *, n_heads, d_key, approx_recip):
    """Fused all-heads attention for one batch element.

    q_ref    : (1, Lq, D)   current batch element (f32)
    k_ref    : (1, Lk, D)
    v_ref    : (1, Lk, D)
    wqkv_ref : (D, 3D)      [Wq^T | Wk^T | Wv^T]   (bf16 on the fast path)
    bqkv_ref : (1, 3D)      [bq | bk | bv]         (f32)
    wo_ref   : (D, D)       Wo^T                   (bf16 on the fast path)
    bo_ref   : (1, D)       bo                     (f32)
    out_ref  : (1, Lq, D)   f32
    probs_ref: (1, H, Lq, Lk) f32
    """
    Lq = q_ref.shape[1]
    Lk = k_ref.shape[1]
    D = n_heads * d_key
    dk = d_key
    mxu_dtype = wqkv_ref.dtype  # bf16 on the fast path, f32 on the exact path

    # ---- Fused QKV projection: ONE wide MXU matmul --------------------------------
    x = jnp.concatenate([q_ref[0], k_ref[0], v_ref[0]], axis=0).astype(mxu_dtype)  # (Lq+2Lk, D)
    proj = jnp.dot(x, wqkv_ref[...], preferred_element_type=jnp.float32) + bqkv_ref[...]
    # proj: (Lq+2Lk, 3D) f32; Q lives in rows [0,Lq) lanes [0,D), K in rows [Lq,Lq+Lk)
    # lanes [D,2D), V in rows [Lq+Lk,Lq+2Lk) lanes [2D,3D).

    # Head-major (H, L, dk) stacks carved directly from the projection result.
    qh = jnp.stack([proj[:Lq, h * dk:(h + 1) * dk]
                    for h in range(n_heads)], axis=0)                        # (H, Lq, dk)
    kh = jnp.stack([proj[Lq:Lq + Lk, D + h * dk:D + (h + 1) * dk]
                    for h in range(n_heads)], axis=0)                        # (H, Lk, dk)
    vh = jnp.stack([proj[Lq + Lk:, 2 * D + h * dk:2 * D + (h + 1) * dk]
                    for h in range(n_heads)], axis=0)                        # (H, Lk, dk)

    # ---- Head-batched scores / softmax / PV ----------------------------------------
    scale = 1.0 / math.sqrt(d_key)
    scores = jnp.einsum("hqd,hkd->hqk", qh.astype(mxu_dtype), kh.astype(mxu_dtype),
                        preferred_element_type=jnp.float32) * scale          # (H, Lq, Lk) f32
    # TODO(synk): optional boolean `mask` (masked_fill with -inf) not plumbed; the
    # module's default mask=None path is reproduced exactly.

    m = jnp.max(scores, axis=-1, keepdims=True)
    e = jnp.exp(scores - m)
    s = jnp.sum(e, axis=-1, keepdims=True)
    if approx_recip:
        # EUP reciprocal (free slot); only used on the relaxed-tolerance bf16 path.
        probs = e * pl.reciprocal(s, approx=True)
    else:
        probs = e / s
    probs_ref[0] = probs.astype(probs_ref.dtype)     # single (H, Lq, Lk) store

    # Dropout(p=0.1) is identity in eval mode -> no-op.
    ctx = jnp.einsum("hqk,hkd->hqd", probs.astype(mxu_dtype), vh.astype(mxu_dtype),
                     preferred_element_type=jnp.float32)                     # (H, Lq, dk)

    # Re-assemble heads along the model dim and do ONE wide output projection.
    a = jnp.concatenate([ctx[h] for h in range(n_heads)], axis=-1).astype(mxu_dtype)  # (Lq, D)
    out = jnp.dot(a, wo_ref[...], preferred_element_type=jnp.float32) + bo_ref[...]
    out_ref[0] = out.astype(out_ref.dtype)


def pack_params(params, *, mxu_dtype=jnp.bfloat16):
    """One-time parameter prep, hoisted out of the forward path.

    Pre-transposes the Linear weights ((out,in) -> (in,out)), fuses the three
    projection weights/biases into one (D, 3D) weight and one (1, 3D) bias, and casts
    the matmul operands to `mxu_dtype` (bf16 is native on v5e/v6e/v7x MXUs; pass
    jnp.float32 for bit-tight checking).  Biases stay f32 (VPU adds are done in f32).
    """
    D = params["wq"].shape[0]
    w_qkv = jnp.concatenate([params["wq"].T, params["wk"].T, params["wv"].T], axis=1)  # (D, 3D)
    b_qkv = jnp.concatenate([params["bq"], params["bk"], params["bv"]]).reshape(1, 3 * D)
    return {
        "w_qkv": w_qkv.astype(mxu_dtype),                    # (D, 3D)
        "b_qkv": b_qkv.astype(jnp.float32),                  # (1, 3D)
        "wo_t": params["wo"].T.astype(mxu_dtype),            # (D, D)
        "bo": params["bo"].reshape(1, D).astype(jnp.float32) # (1, D)
    }


def multi_head_attention(query, key, value, packed, *, n_heads):
    """query/key/value: (B, L, D) float32. Returns (output (B,Lq,D), probs (B,H,Lq,Lk)), f32."""
    B, Lq, D = query.shape
    Bk, Lk, Dk = key.shape
    Bv, Lv, Dv = value.shape
    assert (B, D) == (Bk, Dk) == (Bv, Dv) and Lk == Lv
    assert D % n_heads == 0
    dk = D // n_heads

    approx_recip = packed["w_qkv"].dtype != jnp.float32
    kernel = functools.partial(_mha_kernel, n_heads=n_heads, d_key=dk,
                               approx_recip=approx_recip)

    def batch_map(b):
        return (b, 0, 0)

    # Constant index maps -> weights/biases DMA'd once and kept VMEM-resident.
    const2d = lambda b: (0, 0)

    out, probs = pl.pallas_call(
        kernel,
        out_shape=(
            jax.ShapeDtypeStruct((B, Lq, D), jnp.float32),
            jax.ShapeDtypeStruct((B, n_heads, Lq, Lk), jnp.float32),
        ),
        grid=(B,),
        in_specs=[
            pl.BlockSpec((1, Lq, D), batch_map),             # query
            pl.BlockSpec((1, Lk, D), batch_map),             # key
            pl.BlockSpec((1, Lk, D), batch_map),             # value
            pl.BlockSpec(packed["w_qkv"].shape, const2d),    # [Wq^T | Wk^T | Wv^T]
            pl.BlockSpec(packed["b_qkv"].shape, const2d),    # [bq | bk | bv]
            pl.BlockSpec(packed["wo_t"].shape, const2d),     # Wo^T
            pl.BlockSpec(packed["bo"].shape, const2d),       # bo
        ],
        out_specs=[
            pl.BlockSpec((1, Lq, D), batch_map),                          # output
            pl.BlockSpec((1, n_heads, Lq, Lk), lambda b: (b, 0, 0, 0)),   # attention probs
        ],
        # grid=(B,) keeps >=2 "parallel" blocks so both v7x TensorCores get work;
        # on single-TC v5e/v6e the per-step overhead (~0.35us x B) is negligible.
        # TODO(synk): at real model sizes (d_model=512, L>=512) add an Lq tile axis and
        # set vmem_limit_bytes so the double-buffered probs block fits v7x's 64 MiB VMEM.
        compiler_params=pltpu.CompilerParams(
            dimension_semantics=("parallel",),
        ),
    )(query, key, value, packed["w_qkv"], packed["b_qkv"], packed["wo_t"], packed["bo"])
    return out, probs


def _reference(query, key, value, params, n_heads):
    """Pure-JAX reference mirroring the PyTorch forward (eval mode)."""
    B, Lq, D = query.shape
    dk = D // n_heads
    Q = query @ params["wq"].T + params["bq"]
    K = key @ params["wk"].T + params["bk"]
    V = value @ params["wv"].T + params["bv"]
    Q = Q.reshape(B, -1, n_heads, dk).transpose(0, 2, 1, 3)
    K = K.reshape(B, -1, n_heads, dk).transpose(0, 2, 1, 3)
    V = V.reshape(B, -1, n_heads, dk).transpose(0, 2, 1, 3)
    scores = jnp.einsum("bhqd,bhkd->bhqk", Q, K) / math.sqrt(dk)
    probs = jax.nn.softmax(scores, axis=-1)
    A = jnp.einsum("bhqk,bhkd->bhqd", probs, V)
    A = A.transpose(0, 2, 1, 3).reshape(B, -1, D)
    out = A @ params["wo"].T + params["bo"]
    return out, probs


if __name__ == "__main__":
    # Small shapes consistent with the module: d_model=32, n_heads=4 (d_key=8), seq=8.
    B, Lq, Lk, D, H = 2, 8, 8, 32, 4

    key0 = jax.random.PRNGKey(0)
    ks = jax.random.split(key0, 11)
    scale = 1.0 / math.sqrt(D)
    params = {
        "wq": jax.random.uniform(ks[0], (D, D), jnp.float32, -scale, scale),  # (out, in)
        "bq": jax.random.uniform(ks[1], (D,), jnp.float32, -scale, scale),
        "wk": jax.random.uniform(ks[2], (D, D), jnp.float32, -scale, scale),
        "bk": jax.random.uniform(ks[3], (D,), jnp.float32, -scale, scale),
        "wv": jax.random.uniform(ks[4], (D, D), jnp.float32, -scale, scale),
        "bv": jax.random.uniform(ks[5], (D,), jnp.float32, -scale, scale),
        "wo": jax.random.uniform(ks[6], (D, D), jnp.float32, -scale, scale),
        "bo": jax.random.uniform(ks[7], (D,), jnp.float32, -scale, scale),
    }

    query = jax.random.normal(ks[8], (B, Lq, D), jnp.float32)
    key_in = jax.random.normal(ks[9], (B, Lk, D), jnp.float32)
    value = jax.random.normal(ks[10], (B, Lk, D), jnp.float32)

    ref_out, ref_probs = _reference(query, key_in, value, params, H)

    # --- Exact path: f32 MXU operands, exact divide — bit-tight vs the reference. ----
    packed_f32 = pack_params(params, mxu_dtype=jnp.float32)
    out, probs = multi_head_attention(query, key_in, value, packed_f32, n_heads=H)
    out = jax.block_until_ready(out)
    probs = jax.block_until_ready(probs)
    assert out.shape == (B, Lq, D) and probs.shape == (B, H, Lq, Lk)
    assert jnp.allclose(out, ref_out, atol=1e-4, rtol=1e-4)
    assert jnp.allclose(probs, ref_probs, atol=1e-5, rtol=1e-5)

    # --- Fast path (default): bf16 MXU operands + approx reciprocal; f32 accumulation,
    # f32 softmax/bias/outputs.  Tolerances relaxed to bf16-operand rounding level.
    packed_bf16 = pack_params(params, mxu_dtype=jnp.bfloat16)
    out_f, probs_f = multi_head_attention(query, key_in, value, packed_bf16, n_heads=H)
    out_f = jax.block_until_ready(out_f)
    probs_f = jax.block_until_ready(probs_f)
    assert out_f.shape == (B, Lq, D) and probs_f.shape == (B, H, Lq, Lk)
    assert jnp.allclose(out_f, ref_out, atol=3e-2, rtol=3e-2)
    assert jnp.allclose(probs_f, ref_probs, atol=2e-2)

    print("KERNEL_OK")
</pallas_src>

<mosaic_0001>
module attributes {stable_mosaic.version = 11 : i64} {
  func.func @_mha_kernel(%arg0: i32, %arg1: memref<1x8x32xf32, #tpu.memory_space<vmem>>, %arg2: memref<1x8x32xf32, #tpu.memory_space<vmem>>, %arg3: memref<1x8x32xf32, #tpu.memory_space<vmem>>, %arg4: memref<32x96xf32, #tpu.memory_space<vmem>>, %arg5: memref<1x96xf32, #tpu.memory_space<vmem>>, %arg6: memref<32x32xf32, #tpu.memory_space<vmem>>, %arg7: memref<1x32xf32, #tpu.memory_space<vmem>>, %arg8: memref<1x8x32xf32, #tpu.memory_space<vmem>>, %arg9: memref<1x4x8x8xf32, #tpu.memory_space<vmem>>) attributes {dimension_semantics = [#tpu.dimension_semantics<parallel>], iteration_bounds = array<i64: 2>, scalar_prefetch = 0 : i64, scratch_operands = 0 : i64, tpu.core_type = #tpu.core_type<tc>, window_params = [{transform_indices = @transform_0, window_bounds = array<i64: 1, 8, 32>}, {transform_indices = @transform_1, window_bounds = array<i64: 1, 8, 32>}, {transform_indices = @transform_2, window_bounds = array<i64: 1, 8, 32>}, {pipeline_mode = #tpu.pipeline_mode<synchronous>, transform_indices = @transform_3, window_bounds = array<i64: 32, 96>}, {pipeline_mode = #tpu.pipeline_mode<synchronous>, transform_indices = @transform_4, window_bounds = array<i64: 1, 96>}, {pipeline_mode = #tpu.pipeline_mode<synchronous>, transform_indices = @transform_5, window_bounds = array<i64: 32, 32>}, {pipeline_mode = #tpu.pipeline_mode<synchronous>, transform_indices = @transform_6, window_bounds = array<i64: 1, 32>}, {transform_indices = @transform_7, window_bounds = array<i64: 1, 8, 32>}, {transform_indices = @transform_8, window_bounds = array<i64: 1, 4, 8, 8>}]} {
    %c0 = arith.constant 0 : index
    %c0_0 = arith.constant 0 : index
    %c0_1 = arith.constant 0 : index
    %0 = vector.load %arg1[%c0, %c0_0, %c0_1] : memref<1x8x32xf32, #tpu.memory_space<vmem>>, vector<1x8x32xf32>
    %1 = vector.shape_cast %0 : vector<1x8x32xf32> to vector<8x32xf32>
    %c0_2 = arith.constant 0 : index
    %c0_3 = arith.constant 0 : index
    %c0_4 = arith.constant 0 : index
    %2 = vector.load %arg2[%c0_2, %c0_3, %c0_4] : memref<1x8x32xf32, #tpu.memory_space<vmem>>, vector<1x8x32xf32>
    %3 = vector.shape_cast %2 : vector<1x8x32xf32> to vector<8x32xf32>
    %c0_5 = arith.constant 0 : index
    %c0_6 = arith.constant 0 : index
    %c0_7 = arith.constant 0 : index
    %4 = vector.load %arg3[%c0_5, %c0_6, %c0_7] : memref<1x8x32xf32, #tpu.memory_space<vmem>>, vector<1x8x32xf32>
    %5 = vector.shape_cast %4 : vector<1x8x32xf32> to vector<8x32xf32>
    %6 = tpu.concatenate %1, %3, %5 in 0 : vector<8x32xf32>, vector<8x32xf32>, vector<8x32xf32> -> vector<24x32xf32>
    %c0_8 = arith.constant 0 : index
    %c0_9 = arith.constant 0 : index
    %7 = vector.load %arg4[%c0_8, %c0_9] : memref<32x96xf32, #tpu.memory_space<vmem>>, vector<32x96xf32>
    %cst = arith.constant dense<0.000000e+00> : vector<24x96xf32>
    %8 = tpu.matmul %6, %7, %cst {dimension_numbers = #tpu.dot_dimension_numbers<[1], [0], [0], [1], [0, 0, 1, 1], [], []>} : vector<24x32xf32>, vector<32x96xf32>, vector<24x96xf32> -> vector<24x96xf32>
    %c0_10 = arith.constant 0 : index
    %c0_11 = arith.constant 0 : index
    %9 = vector.load %arg5[%c0_10, %c0_11] : memref<1x96xf32, #tpu.memory_space<vmem>>, vector<1x96xf32>
    %10 = vector.broadcast %9 : vector<1x96xf32> to vector<24x96xf32>
    %11 = arith.addf %8, %10 : vector<24x96xf32>
    %12 = vector.extract_strided_slice %11 {offsets = [0, 0], sizes = [8, 8], strides = [1, 1]} : vector<24x96xf32> to vector<8x8xf32>
    %13 = vector.extract_strided_slice %11 {offsets = [0, 8], sizes = [8, 8], strides = [1, 1]} : vector<24x96xf32> to vector<8x8xf32>
    %14 = vector.extract_strided_slice %11 {offsets = [0, 16], sizes = [8, 8], strides = [1, 1]} : vector<24x96xf32> to vector<8x8xf32>
    %15 = vector.extract_strided_slice %11 {offsets = [0, 24], sizes = [8, 8], strides = [1, 1]} : vector<24x96xf32> to vector<8x8xf32>
    %16 = vector.shape_cast %12 : vector<8x8xf32> to vector<1x8x8xf32>
    %17 = vector.shape_cast %13 : vector<8x8xf32> to vector<1x8x8xf32>
    %18 = vector.shape_cast %14 : vector<8x8xf32> to vector<1x8x8xf32>
    %19 = vector.shape_cast %15 : vector<8x8xf32> to vector<1x8x8xf32>
    %20 = tpu.concatenate %16, %17, %18, %19 in 0 : vector<1x8x8xf32>, vector<1x8x8xf32>, vector<1x8x8xf32>, vector<1x8x8xf32> -> vector<4x8x8xf32>
    %21 = vector.extract_strided_slice %11 {offsets = [8, 32], sizes = [8, 8], strides = [1, 1]} : vector<24x96xf32> to vector<8x8xf32>
    %22 = vector.extract_strided_slice %11 {offsets = [8, 40], sizes = [8, 8], strides = [1, 1]} : vector<24x96xf32> to vector<8x8xf32>
    %23 = vector.extract_strided_slice %11 {offsets = [8, 48], sizes = [8, 8], strides = [1, 1]} : vector<24x96xf32> to vector<8x8xf32>
    %24 = vector.extract_strided_slice %11 {offsets = [8, 56], sizes = [8, 8], strides = [1, 1]} : vector<24x96xf32> to vector<8x8xf32>
    %25 = vector.shape_cast %21 : vector<8x8xf32> to vector<1x8x8xf32>
    %26 = vector.shape_cast %22 : vector<8x8xf32> to vector<1x8x8xf32>
    %27 = vector.shape_cast %23 : vector<8x8xf32> to vector<1x8x8xf32>
    %28 = vector.shape_cast %24 : vector<8x8xf32> to vector<1x8x8xf32>
    %29 = tpu.concatenate %25, %26, %27, %28 in 0 : vector<1x8x8xf32>, vector<1x8x8xf32>, vector<1x8x8xf32>, vector<1x8x8xf32> -> vector<4x8x8xf32>
    %30 = vector.extract_strided_slice %11 {offsets = [16, 64], sizes = [8, 8], strides = [1, 1]} : vector<24x96xf32> to vector<8x8xf32>
    %31 = vector.extract_strided_slice %11 {offsets = [16, 72], sizes = [8, 8], strides = [1, 1]} : vector<24x96xf32> to vector<8x8xf32>
    %32 = vector.extract_strided_slice %11 {offsets = [16, 80], sizes = [8, 8], strides = [1, 1]} : vector<24x96xf32> to vector<8x8xf32>
    %33 = vector.extract_strided_slice %11 {offsets = [16, 88], sizes = [8, 8], strides = [1, 1]} : vector<24x96xf32> to vector<8x8xf32>
    %34 = vector.shape_cast %30 : vector<8x8xf32> to vector<1x8x8xf32>
    %35 = vector.shape_cast %31 : vector<8x8xf32> to vector<1x8x8xf32>
    %36 = vector.shape_cast %32 : vector<8x8xf32> to vector<1x8x8xf32>
    %37 = vector.shape_cast %33 : vector<8x8xf32> to vector<1x8x8xf32>
    %38 = tpu.concatenate %34, %35, %36, %37 in 0 : vector<1x8x8xf32>, vector<1x8x8xf32>, vector<1x8x8xf32>, vector<1x8x8xf32> -> vector<4x8x8xf32>
    "tpu.trace_start"() <{level = 10 : i32, message = "hqd,hkd->hqk"}> : () -> ()
    %cst_12 = arith.constant dense<0.000000e+00> : vector<4x8x8xf32>
    %39 = tpu.matmul %20, %29, %cst_12 {dimension_numbers = #tpu.dot_dimension_numbers<[2], [2], [1], [1], [0, 0, 0, 1, 1, 1], [0], [0]>} : vector<4x8x8xf32>, vector<4x8x8xf32>, vector<4x8x8xf32> -> vector<4x8x8xf32>
    "tpu.trace_stop"() : () -> ()
    %cst_13 = arith.constant 0.353553385 : f32
    %40 = vector.broadcast %cst_13 : f32 to vector<4x8x8xf32>
    %41 = arith.mulf %39, %40 : vector<4x8x8xf32>
    %cst_14 = arith.constant dense<0xFF800000> : vector<4x8xf32>
    %42 = vector.multi_reduction <maximumf>, %41, %cst_14 [2] : vector<4x8x8xf32> to vector<4x8xf32>
    %43 = vector.shape_cast %42 : vector<4x8xf32> to vector<4x8x1xf32>
    %44 = vector.broadcast %43 : vector<4x8x1xf32> to vector<4x8x8xf32>
    %45 = arith.subf %41, %44 : vector<4x8x8xf32>
    %46 = math.exp %45 : vector<4x8x8xf32>
    %cst_15 = arith.constant dense<0.000000e+00> : vector<4x8xf32>
    %47 = vector.multi_reduction <add>, %46, %cst_15 [2] : vector<4x8x8xf32> to vector<4x8xf32>
    %48 = vector.shape_cast %47 : vector<4x8xf32> to vector<4x8x1xf32>
    %49 = vector.broadcast %48 : vector<4x8x1xf32> to vector<4x8x8xf32>
    %50 = arith.divf %46, %49 : vector<4x8x8xf32>
    %c0_16 = arith.constant 0 : index
    %c0_17 = arith.constant 0 : index
    %c0_18 = arith.constant 0 : index
    %c0_19 = arith.constant 0 : index
    %51 = vector.load %arg9[%c0_16, %c0_17, %c0_18, %c0_19] : memref<1x4x8x8xf32, #tpu.memory_space<vmem>>, vector<1x4x8x8xf32>
    %52 = vector.shape_cast %51 : vector<1x4x8x8xf32> to vector<4x8x8xf32>
    %53 = vector.shape_cast %50 : vector<4x8x8xf32> to vector<1x4x8x8xf32>
    tpu.vector_store %arg9[%c0_16, %c0_17, %c0_18, %c0_19], %53 {strides = array<i32>} : memref<1x4x8x8xf32, #tpu.memory_space<vmem>>, vector<1x4x8x8xf32>,
    "tpu.trace_start"() <{level = 10 : i32, message = "hqk,hkd->hqd"}> : () -> ()
    %cst_20 = arith.constant dense<0.000000e+00> : vector<4x8x8xf32>
    %54 = tpu.matmul %50, %38, %cst_20 {dimension_numbers = #tpu.dot_dimension_numbers<[2], [1], [1], [2], [0, 0, 0, 1, 1, 2], [0], [0]>} : vector<4x8x8xf32>, vector<4x8x8xf32>, vector<4x8x8xf32> -> vector<4x8x8xf32>
    "tpu.trace_stop"() : () -> ()
    %55 = vector.extract_strided_slice %54 {offsets = [0, 0, 0], sizes = [1, 8, 8], strides = [1, 1, 1]} : vector<4x8x8xf32> to vector<1x8x8xf32>
    %56 = vector.shape_cast %55 : vector<1x8x8xf32> to vector<8x8xf32>
    %57 = vector.extract_strided_slice %54 {offsets = [1, 0, 0], sizes = [1, 8, 8], strides = [1, 1, 1]} : vector<4x8x8xf32> to vector<1x8x8xf32>
    %58 = vector.shape_cast %57 : vector<1x8x8xf32> to vector<8x8xf32>
    %59 = vector.extract_strided_slice %54 {offsets = [2, 0, 0], sizes = [1, 8, 8], strides = [1, 1, 1]} : vector<4x8x8xf32> to vector<1x8x8xf32>
    %60 = vector.shape_cast %59 : vector<1x8x8xf32> to vector<8x8xf32>
    %61 = vector.extract_strided_slice %54 {offsets = [3, 0, 0], sizes = [1, 8, 8], strides = [1, 1, 1]} : vector<4x8x8xf32> to vector<1x8x8xf32>
    %62 = vector.shape_cast %61 : vector<1x8x8xf32> to vector<8x8xf32>
    %63 = tpu.concatenate %56, %58, %60, %62 in 1 : vector<8x8xf32>, vector<8x8xf32>, vector<8x8xf32>, vector<8x8xf32> -> vector<8x32xf32>
    %c0_21 = arith.constant 0 : index
    %c0_22 = arith.constant 0 : index
    %64 = vector.load %arg6[%c0_21, %c0_22] : memref<32x32xf32, #tpu.memory_space<vmem>>, vector<32x32xf32>
    %cst_23 = arith.constant dense<0.000000e+00> : vector<8x32xf32>
    %65 = tpu.matmul %63, %64, %cst_23 {dimension_numbers = #tpu.dot_dimension_numbers<[1], [0], [0], [1], [0, 0, 1, 1], [], []>} : vector<8x32xf32>, vector<32x32xf32>, vector<8x32xf32> -> vector<8x32xf32>
    %c0_24 = arith.constant 0 : index
    %c0_25 = arith.constant 0 : index
    %66 = vector.load %arg7[%c0_24, %c0_25] : memref<1x32xf32, #tpu.memory_space<vmem>>, vector<1x32xf32>
    %67 = vector.broadcast %66 : vector<1x32xf32> to vector<8x32xf32>
    %68 = arith.addf %65, %67 : vector<8x32xf32>
    %c0_26 = arith.constant 0 : index
    %c0_27 = arith.constant 0 : index
    %c0_28 = arith.constant 0 : index
    %69 = vector.load %arg8[%c0_26, %c0_27, %c0_28] : memref<1x8x32xf32, #tpu.memory_space<vmem>>, vector<1x8x32xf32>
    %70 = vector.shape_cast %69 : vector<1x8x32xf32> to vector<8x32xf32>
    %71 = vector.shape_cast %68 : vector<8x32xf32> to vector<1x8x32xf32>
    tpu.vector_store %arg8[%c0_26, %c0_27, %c0_28], %71 {strides = array<i32>} : memref<1x8x32xf32, #tpu.memory_space<vmem>>, vector<1x8x32xf32>,
    return
  }
  func.func @transform_0(%arg0: i32) -> (i32, i32, i32) {
    %c0_i32 = arith.constant 0 : i32
    %c0_i32_0 = arith.constant 0 : i32
    %c0_i32_1 = arith.constant 0 : i32
    return %arg0, %c0_i32, %c0_i32_0 : i32, i32, i32
  }
  func.func @transform_1(%arg0: i32) -> (i32, i32, i32) {
    %c0_i32 = arith.constant 0 : i32
    %c0_i32_0 = arith.constant 0 : i32
    %c0_i32_1 = arith.constant 0 : i32
    return %arg0, %c0_i32, %c0_i32_0 : i32, i32, i32
  }
  func.func @transform_2(%arg0: i32) -> (i32, i32, i32) {
    %c0_i32 = arith.constant 0 : i32
    %c0_i32_0 = arith.constant 0 : i32
    %c0_i32_1 = arith.constant 0 : i32
    return %arg0, %c0_i32, %c0_i32_0 : i32, i32, i32
  }
  func.func @transform_3(%arg0: i32) -> (i32, i32) {
    %c0_i32 = arith.constant 0 : i32
    %c0_i32_0 = arith.constant 0 : i32
    %c0_i32_1 = arith.constant 0 : i32
    return %c0_i32, %c0_i32_0 : i32, i32
  }
  func.func @transform_4(%arg0: i32) -> (i32, i32) {
    %c0_i32 = arith.constant 0 : i32
    %c0_i32_0 = arith.constant 0 : i32
    %c0_i32_1 = arith.constant 0 : i32
    return %c0_i32, %c0_i32_0 : i32, i32
  }
  func.func @transform_5(%arg0: i32) -> (i32, i32) {
    %c0_i32 = arith.constant 0 : i32
    %c0_i32_0 = arith.constant 0 : i32
    %c0_i32_1 = arith.constant 0 : i32
    return %c0_i32, %c0_i32_0 : i32, i32
  }
  func.func @transform_6(%arg0: i32) -> (i32, i32) {
    %c0_i32 = arith.constant 0 : i32
    %c0_i32_0 = arith.constant 0 : i32
    %c0_i32_1 = arith.constant 0 : i32
    return %c0_i32, %c0_i32_0 : i32, i32
  }
  func.func @transform_7(%arg0: i32) -> (i32, i32, i32) {
    %c0_i32 = arith.constant 0 : i32
    %c0_i32_0 = arith.constant 0 : i32
    %c0_i32_1 = arith.constant 0 : i32
    return %arg0, %c0_i32, %c0_i32_0 : i32, i32, i32
  }
  func.func @transform_8(%arg0: i32) -> (i32, i32, i32, i32) {
    %c0_i32 = arith.constant 0 : i32
    %c0_i32_0 = arith.constant 0 : i32
    %c0_i32_1 = arith.constant 0 : i32
    %c0_i32_2 = arith.constant 0 : i32
    return %arg0, %c0_i32, %c0_i32_0, %c0_i32_1 : i32, i32, i32, i32
  }
}

</mosaic_0001>

<bundles_post_ra>
// kernel: tpu_custom_call.1
= control target key start
LH: loop header
LB: loop body
LE: loop exit
PB: predicated region body
PF: predicated region fallthrough
CT: control target
= control target key end

     0   :  { %s2542_s0 = inlined_call_operand.hbm [shape: f32[2,8,32], index: 0, kind: input, shape index: {}]   ;;  %s2543_s1 = inlined_call_operand.hbm [shape: f32[2,8,32], index: 1, kind: input, shape index: {}]   ;;  %s2544_s2 = inlined_call_operand.hbm [shape: f32[2,8,32], index: 2, kind: input, shape index: {}]   ;;  %s2545_s3 = inlined_call_operand.hbm [shape: f32[32,96], index: 3, kind: input, shape index: {}]   ;;  %s2546_s4 = inlined_call_operand.vmem [shape: f32[1,96], index: 4, kind: input, shape index: {}]   ;;  %s2547_s5 = inlined_call_operand.hbm [shape: f32[32,32], index: 5, kind: input, shape index: {}]   ;;  %s2548_s6 = inlined_call_operand.vmem [shape: f32[1,32], index: 6, kind: input, shape index: {}]   ;;  %s2549_s7 = inlined_call_operand.hbm [shape: f32[2,8,32], index: 7, kind: output, shape index: {0}]   ;;  %s2550_s8 = inlined_call_operand.hbm [shape: f32[2,4,8,8], index: 8, kind: output, shape index: {1}]  }
   0x1   :  { %2569 = sst [smem:[#allocation23_spill]] %s2543_s1 }
   0x2   :  { %2570 = sst [smem:[#allocation24_spill]] %s2545_s3 }
   0x3   :  { %14 = vsyncpa [#allocation3], 0 }
   0x4   :  { %16 = vsyncpa [#allocation3 + $0x1], 0 }
   0x5   :  { %17 = vsyncpa [#allocation6], 0 }
   0x6   :  { %19 = vsyncpa [#allocation6 + $0x1], 0 }
   0x7   :  { %20 = vsyncpa [#allocation9], 0 }
   0x8   :  { %21 = vsyncpa [#allocation4], 0 }
   0x9   :  { %23 = vsyncpa [#allocation4 + $0x1], 0 }
   0xa   :  { %24 = vsyncpa [#allocation13], 0 }
   0xb   :  { %26 = vsyncpa [#allocation13 + $0x1], 0  ;;  %s2104_s27 = smov 0   ;;  %s2106_s28 = smov 0  }
   0xc   :  { %s2108_s29 = smov 0   ;;  %s2110_s30 = smov 0  }
   0xd LB: > { %2571 = sst [smem:[#allocation19_spill]] %s2036_s30  ;;  %s2125_s9 = sadd.s32 4294967295, %s2036_s30   ;;  %s2036_s30 = sphi %s2110_s30, %s2603_s30   ;;  %s2032_s29 = sphi %s2108_s29, %s2607_s29   ;;  %s2028_s28 = sphi %s2106_s28, %s2606_s28   ;;  %s2024_s27 = sphi %s2104_s27, %s2605_s27  }
   0xe   : > { %s1519_s10 = sadd.s32 4294967294, %s2036_s30   ;;  %p52_p0 = scmp.ne.s32.totalorder %s2028_s28, %s2024_s27 }
   0xf   : > { %p2551_p1 = scmp.eq.s32.totalorder %s2125_s9, 0  ;;  %p218_p3 = scmp.eq.s32.totalorder %s1519_s10, 1 }
  0x10   : > { %p1520_p5 = scmp.ge.s32.totalorder %s2036_s30, 1  ;;  %p251_p7 = scmp.lt.s32.totalorder %s2036_s30, 3 }
  0x11   : > { %p2134_p4 = por %p2551_p1, %p52_p0  ;;  %p2139_p6 = por %p218_p3, %p52_p0 }
  0x12   : > { %p2144_p8 = pnand %p1520_p5, %p251_p7  ;;  %s2038_s14 = smov [#allocation8]  }
  0x13   : > { %s2572_s11 = scalar_select %p2134_p4, 1, 0 }
  0x14   : > { %s2573_s12 = scalar_select %p2139_p6, 1, 0 }
  0x15   : > { %s2575_s13 = scalar_select %p2144_p8, 1, 0 }
  0x16   : > { %2574 = sst [smem:[#allocation20_spill]] %s2573_s12  ;;  %s263_s15 = sshll.u32 %s2038_s14, 4  ;;  %s2148_s15 = int_to_ptr.vmem [resolvable:$true] %s263_s15 }
  0x17   : > { %p1690_p9 = pneg %p2144_p8  ;;  %s2160_s17 = sadd.s32 1, %s2036_s30  }
  0x18   : > { %2577 = sst [smem:[#allocation21_spill]] %s2160_s17  ;;  %s39_s18 = sadd.s32 1, %s2032_s29 }
  0x19   : > { %p2155_p11 = pnand %p1690_p9, %p2551_p1  ;;  %s36_s19 = ssub.s32 %s2036_s30, %s2160_s17 }
  0x1a   : > { %s2578_s3 = sld [smem:[#allocation24_spill]] }
  0x1b   : > { %s2576_s16 = scalar_select %p2155_p11, 1, 0 }
  0x1c   : > { %p2558_p13 = pneg %p2155_p11 }
  0x20   : > { %s1784_s22 = scalar_lea.hbm %s2578_s3, 512 }
  0x21   : > { %p1785_p12 = scmp.ne.s32.totalorder %s2578_s3, %s1784_s22  ;;  %p1791_p5 = scmp.lt.u32.totalorder %s1784_s22, %s2578_s3 }
  0x23   : > { %p1787_p0 = pnand %p2558_p13, %p1785_p12 }
  0x25   : > { %p1788_p3 = pneg %p1787_p0 }
  0x27   : > { %p1793_p7 = pnand %p1791_p5, %p1788_p3 }
  0x29   : > { %1796 = shalt.err (!%p1793_p7)
}
  0x2a   : > { %s1797_s10 = scalar_lea.vmem %s2148_s15, 512  ;;  %p1805_p2 = scmp.lt.s32.totalorder %s2148_s15, %s2148_s15 }
  0x2b   : > { %p1798_p9 = scmp.ne.s32.totalorder %s2148_s15, %s1797_s10  ;;  %p1806_p12 = scmp.lt.s32.totalorder %s1797_s10, %s1797_s10 }
  0x2d   : > { %p1800_p10 = pnand %p1798_p9, %p2558_p13  ;;  %p1807_p0 = por %p1806_p12, %p1805_p2 }
  0x2f   : > { %p1801_p1 = pneg %p1800_p10 }
  0x31   : > { %p1808_p6 = pnand %p1807_p0, %p1801_p1 }
  0x33   : > { %1811 = shalt.err (!%p1808_p6)
}
  0x34   : > { %s2552_s14 = smov 128   ;;  %s2553_s20 = smov 8  }
  0x35   : > { %1693 = dma.hbm_to_vmem [thread:$0]  (!%p2155_p11), %s2578_s3, 512, %s2148_s15, [#allocation9], %s2552_s14, %s2552_s14, %s2553_s20  }
  0x36   : > { %p37_p1 = scmp.eq.s32.totalorder %s36_s19, 0  ;;  %p46_p2 = scmp.ne.s32.totalorder %s2032_s29, %s2028_s28 }
  0x37   : > { %p47_p6 = scmp.eq.s32.totalorder %s2036_s30, 0  ;;  %p1716_p10 = scmp.lt.s32.totalorder %s2036_s30, 2 }
  0x38   : > { %s2200_s23 = scalar_select %p37_p1, %s2032_s29, %s39_s18  }
  0x39   : > { %p48_p3 = por %p47_p6, %p46_p2  ;;  %p2580_p5 = scmp.eq.s32.totalorder %s2125_s9, 1 }
  0x3a   : > { %2579 = sst [smem:[#allocation22_spill]] %s2200_s23  ;;  %s2554_s25 = sand.u32 1, %s2032_s29  }
  0x3b   : > { %p2204_p7 = por %p2580_p5, %p46_p2  ;;  %s2210_s26 = sshll.u32 %s2036_s30, 7 }
  0x3c   : > { %s2214_s10 = sshll.u32 %s2554_s25, 3  ;;  %p2216_p9 = pnand %p1716_p10, %p48_p3 }
  0x3d   : > { %s2581_s24 = scalar_select %p2204_p7, 1, 0 }
  0x3e   : > { %s2582_s15 = scalar_select %p2216_p9, 1, 0 }
  0x3f   : > { %s314_s18 = sand.u32 1, %s2036_s30   ;;  %s2583_s1 = sld [smem:[#allocation23_spill]] }
  0x40   : > { %s318_s14 = scalar_lea.vmem [#allocation5], %s2214_s10  ;;  %s2230_s25 = scalar_lea.sflag [#allocation6], %s314_s18 }
  0x41   : > { %s325_s20 = sshll.u32 %s318_s14, 4  ;;  %p2236_p0 = pneg %p2216_p9  ;;  %s2228_s20 = int_to_ptr.vmem [resolvable:$true] %s325_s20 }
  0x43   : > { %s2584_s23 = scalar_select %p2236_p0, 1, 0 }
  0x45   : > { %s2225_s22 = scalar_lea.hbm %s2583_s1, %s2210_s26  ;;  %s1817_s17 = scalar_lea.hbm %s2583_s1, 256 }
  0x46   : > { %s1812_s3 = scalar_lea.hbm %s2225_s22, 128  ;;  %p1818_p6 = scmp.lt.u32.totalorder %s2225_s22, %s2583_s1 }
  0x47   : > { %p1813_p12 = scmp.ne.s32.totalorder %s2225_s22, %s1812_s3  ;;  %p1819_p10 = scmp.lt.u32.totalorder %s1817_s17, %s1812_s3 }
  0x48   : > { %p1821_p5 = scmp.lt.u32.totalorder %s1812_s3, %s2225_s22 }
  0x49   : > { %p1815_p1 = pnand %p2236_p0, %p1813_p12  ;;  %p1820_p3 = por %p1819_p10, %p1818_p6 }
  0x4b   : > { %p1816_p2 = pneg %p1815_p1  ;;  %p1822_p13 = por %p1821_p5, %p1820_p3 }
  0x4d   : > { %p1823_p7 = pnand %p1822_p13, %p1816_p2 }
  0x4f   : > { %1826 = shalt.err (!%p1823_p7)
}
  0x50   : > { %s1827_s18 = scalar_lea.vmem %s2228_s20, 128  ;;  %s2041_s19 = smov [#allocation5]  }
  0x51   : > { %p1828_p12 = scmp.ne.s32.totalorder %s2228_s20, %s1827_s18  ;;  %s1832_s21 = sshll.u32 %s2041_s19, 4  ;;  %s1833_s21 = int_to_ptr.vmem [resolvable:$false] %s1832_s21 }
  0x52   : > { %s1834_s30 = scalar_lea.vmem %s1833_s21, 256  ;;  %p1835_p8 = scmp.lt.s32.totalorder %s2228_s20, %s1833_s21 }
  0x53   : > { %p1830_p1 = pnand %p1828_p12, %p2236_p0  ;;  %p1836_p11 = scmp.lt.s32.totalorder %s1834_s30, %s1827_s18 }
  0x55   : > { %p1831_p4 = pneg %p1830_p1  ;;  %p1837_p6 = por %p1836_p11, %p1835_p8 }
  0x57   : > { %p1838_p10 = pnand %p1837_p6, %p1831_p4 }
  0x59   : > { %1841 = shalt.err (!%p1838_p10)
}
  0x5a   : > { %1703 = dma.hbm_to_vmem [thread:$0]  (!%p2216_p9), %s2225_s22, 128, %s2228_s20, %s2230_s25  }
  0x5b   : > { %s2042_s3 = smov [#allocation10]   ;;  %s1842_s19 = scalar_lea.hbm %s2547_s5, 512 }
  0x5c   : > { %s279_s17 = sshll.u32 %s2042_s3, 4  ;;  %p1843_p8 = scmp.ne.s32.totalorder %s2547_s5, %s1842_s19  ;;  %s280_s17 = int_to_ptr.vmem [resolvable:$true] %s279_s17 }
  0x5d   : > { %p2585_p4 = scmp.ne.s32.totalorder %s2576_s16, 0  ;;  %p1849_p2 = scmp.lt.u32.totalorder %s1842_s19, %s2547_s5 }
  0x5f   : > { %p2586_p11 = pneg %p2585_p4 }
  0x61   : > { %p1845_p13 = pnand %p1843_p8, %p2586_p11 }
  0x63   : > { %p1846_p7 = pneg %p1845_p13 }
  0x65   : > { %p1851_p3 = pnand %p1849_p2, %p1846_p7 }
  0x67   : > { %1854 = shalt.err (!%p1851_p3)
}
  0x68   : > { %s1855_s20 = scalar_lea.vmem %s280_s17, 512  ;;  %p2587_p12 = pmov %p2586_p11 }
  0x69   : > { %p1856_p5 = scmp.ne.s32.totalorder %s280_s17, %s1855_s20  ;;  %p1863_p10 = scmp.lt.s32.totalorder %s280_s17, %s280_s17 }
  0x6a   : > { %p1864_p9 = scmp.lt.s32.totalorder %s1855_s20, %s1855_s20 }
  0x6b   : > { %p1858_p1 = pnand %p1856_p5, %p2587_p12 }
  0x6c   : > { %p1865_p0 = por %p1864_p9, %p1863_p10 }
  0x6d   : > { %p1859_p6 = pneg %p1858_p1 }
  0x6f   : > { %p1866_p8 = pnand %p1865_p0, %p1859_p6 }
  0x71   : > { %1869 = shalt.err (!%p1866_p8)
}
  0x72   : > { %s2588_s1 = smov 8   ;;  %s2589_s12 = smov 128  }
  0x73   : > { %1696 = dma.hbm_to_vmem [thread:$0]  (!%p2585_p4), %s2547_s5, 512, %s280_s17, [#allocation9], %s2589_s12, %s2589_s12, %s2588_s1  }
  0x74   : > { %s2287_s21 = scalar_lea.hbm %s2542_s0, %s2210_s26  ;;  %s300_s16 = scalar_lea.vmem [#allocation2], %s2214_s10 }
  0x75   : > { %s307_s18 = sshll.u32 %s300_s16, 4  ;;  %s2590_s30 = sand.u32 1, %s2032_s29   ;;  %s308_s18 = int_to_ptr.vmem [resolvable:$true] %s307_s18 }
  0x76   : > { %s297_s20 = scalar_lea.sflag [#allocation3], %s2590_s30  ;;  %s1870_s22 = scalar_lea.hbm %s2287_s21, 128 }
  0x77   : > { %p1871_p9 = scmp.ne.s32.totalorder %s2287_s21, %s1870_s22  ;;  %p2591_p0 = scmp.ne.s32.totalorder %s2584_s23, 0 }
  0x78   : > { %s1875_s12 = scalar_lea.hbm %s2542_s0, 256  ;;  %p1876_p4 = scmp.lt.u32.totalorder %s2287_s21, %s2542_s0 }
  0x79   : > { %p1873_p11 = pnand %p1871_p9, %p2591_p0  ;;  %p1877_p7 = scmp.lt.u32.totalorder %s1875_s12, %s1870_s22 }
  0x7a   : > { %p1879_p3 = scmp.lt.u32.totalorder %s1870_s22, %s2287_s21 }
  0x7b   : > { %p1874_p13 = pneg %p1873_p11  ;;  %p1878_p2 = por %p1877_p7, %p1876_p4 }
  0x7d   : > { %p1880_p5 = por %p1879_p3, %p1878_p2 }
  0x7f   : > { %p1881_p12 = pnand %p1880_p5, %p1874_p13 }
  0x81   : > { %1884 = shalt.err (!%p1881_p12)
}
  0x82   : > { %s1885_s19 = scalar_lea.vmem %s308_s18, 128  ;;  %s2043_s16 = smov [#allocation2]  }
  0x83   : > { %p1886_p1 = scmp.ne.s32.totalorder %s308_s18, %s1885_s19  ;;  %s1890_s30 = sshll.u32 %s2043_s16, 4  ;;  %s1891_s30 = int_to_ptr.vmem [resolvable:$false] %s1890_s30 }
  0x84   : > { %s1892_s17 = scalar_lea.vmem %s1891_s30, 256  ;;  %p1893_p8 = scmp.lt.s32.totalorder %s308_s18, %s1891_s30 }
  0x85   : > { %p1888_p6 = pnand %p1886_p1, %p2591_p0  ;;  %p1894_p9 = scmp.lt.s32.totalorder %s1892_s17, %s1885_s19 }
  0x87   : > { %p1889_p10 = pneg %p1888_p6  ;;  %p1895_p11 = por %p1894_p9, %p1893_p8 }
  0x89   : > { %p1896_p4 = pnand %p1895_p11, %p1889_p10 }
  0x8b   : > { %1899 = shalt.err (!%p1896_p4)
}
  0x8c   : > { %p2592_p7 = scmp.ne.s32.totalorder %s2582_s15, 0  ;;  %s2313_s12 = scalar_lea.hbm %s2544_s2, %s2210_s26 }
  0x8d   : > { %s336_s3 = scalar_lea.vmem [#allocation7], %s2214_s10  ;;  %s1900_s19 = scalar_lea.hbm %s2313_s12, 128 }
  0x8e   : > { %1700 = dma.hbm_to_vmem [thread:$0]  (!%p2592_p7), %s2287_s21, 128, %s308_s18, %s297_s20  }
  0x8f   : > { %s343_s14 = sshll.u32 %s336_s3, 4  ;;  %p1901_p13 = scmp.ne.s32.totalorder %s2313_s12, %s1900_s19  ;;  %s344_s14 = int_to_ptr.vmem [resolvable:$true] %s343_s14 }
  0x90   : > { %s1905_s21 = scalar_lea.hbm %s2544_s2, 256  ;;  %p1906_p5 = scmp.lt.u32.totalorder %s2313_s12, %s2544_s2 }
  0x91   : > { %p1903_p2 = pnand %p1901_p13, %p2591_p0  ;;  %p1907_p12 = scmp.lt.u32.totalorder %s1905_s21, %s1900_s19 }
  0x92   : > { %p1909_p6 = scmp.lt.u32.totalorder %s1900_s19, %s2313_s12 }
  0x93   : > { %p1904_p3 = pneg %p1903_p2  ;;  %p1908_p1 = por %p1907_p12, %p1906_p5 }
  0x95   : > { %p1910_p10 = por %p1909_p6, %p1908_p1 }
  0x97   : > { %p1911_p8 = pnand %p1910_p10, %p1904_p3 }
  0x99   : > { %1914 = shalt.err (!%p1911_p8)
}
  0x9a   : > { %s1915_s26 = scalar_lea.vmem %s344_s14, 128  ;;  %s2044_s10 = smov [#allocation7]  }
  0x9b   : > { %p1916_p9 = scmp.ne.s32.totalorder %s344_s14, %s1915_s26  ;;  %s1920_s17 = sshll.u32 %s2044_s10, 4  ;;  %s1921_s17 = int_to_ptr.vmem [resolvable:$false] %s1920_s17 }
  0x9c   : > { %s1922_s22 = scalar_lea.vmem %s1921_s17, 256  ;;  %p1923_p13 = scmp.lt.s32.totalorder %s344_s14, %s1921_s17 }
  0x9d   : > { %p1918_p11 = pnand %p1916_p9, %p2591_p0  ;;  %p1924_p2 = scmp.lt.s32.totalorder %s1922_s22, %s1915_s26 }
  0x9f   : > { %p1919_p4 = pneg %p1918_p11  ;;  %p1925_p7 = por %p1924_p2, %p1923_p13 }
  0xa1   : > { %p1926_p5 = pnand %p1925_p7, %p1919_p4 }
  0xa3   : > { %1929 = shalt.err (!%p1926_p5)
}
  0xa4   : > { %p2593_p12 = scmp.ne.s32.totalorder %s2582_s15, 0  ;;  %p2594_p3 = scmp.ne.s32.totalorder %s2575_s13, 0 }
  0xa5   : > { %s2337_s23 = sand.u32 (!%p2594_p3), 1, %s2028_s28   ;;  %p2595_p0 = scmp.ne.s32.totalorder (!%p2594_p3), %s2572_s11, 0 }
  0xa6   : > { %1706 = dma.hbm_to_vmem [thread:$0]  (!%p2593_p12), %s2313_s12, 128, %s344_s14, %s2230_s25  }
  0xa7   : > { %352 = sbr.rel (%p2594_p3) target bundleno = 1758 (0x6de), region = 48  ;;  %s2340_s1 = sshll.u32 (!%p2594_p3), %s2337_s23, 3 }
  0xa8   : > { %s355_s3 = scalar_lea.sflag (!%p2594_p3), [#allocation3], %s2337_s23  ;;  %s358_s19 = scalar_lea.vmem (!%p2594_p3), [#allocation2], %s2340_s1 }
  0xae   : > { %2003 = dma.done.wait (%p2595_p0), %s355_s3, 128  }
  0xaf   : > { %2005 = vsyncadd (%p2595_p0), %s355_s3, 4294967168  ;;  %s363_s13 = sand.u32 1, %s2125_s9   ;;  %s367_s15 = scalar_lea.vmem [#allocation5], %s2340_s1 }
  0xb0   : > { %s364_s25 = scalar_lea.sflag [#allocation6], %s363_s13 }
  0xb1   : > { %2007 = dma.done.wait (%p2595_p0), %s364_s25, 256  }
  0xb2   : > { %2009 = vsyncadd (%p2595_p0), %s364_s25, 4294967040  ;;  %s376_s12 = scalar_lea.vmem [#allocation7], %s2340_s1  ;;  %p2596_p7 = scmp.eq.s32.totalorder %s2125_s9, 0 }
  0xb4   : > { %2011 = dma.done.wait (%p2596_p7), [#allocation9], 1024   ;;  %p2597_p1 = pmov %p2596_p7 }
  0xb5   : > { %v2045_v0 = vmov 0.0|0.0   ;;  %vm2046_vm0 = vmmov 0   ;;  %v2047_v1 = vmov 0.0   ;;  %v435_v2 = vld [vmem:[#allocation8] sm:$0xff]  ;;  %v436_v3 = vld [vmem:[#allocation8 + $0x8] sm:$0xff]  ;;  %v437_v4 = vld [vmem:[#allocation8 + $0x10] sm:$0xff] }
  0xb6   : > { %2013 = vsyncadd (%p2597_p1), [#allocation9], 4294966272  ;;  %1660 = vmatprep.subr.bf16.mxu0 %v2045_v0  ;;  %1600 = vmatprep.mubr.msk.f32.mxu0 %vm2046_vm0, %v2047_v1  ;;  %v1661_v5 = vpack.c.bf16 %v436_v3, %v435_v2  ;;  %v438_v6 = vld [vmem:[#allocation8 + $0x18] sm:$0xff]  ;;  %vm446_vm1 = vcmask 261120   ;;  %v433_v9 = vld [vmem:[%s367_s15] sm:$0xff]  ;;  %s2048_s16 = smov 104  }
  0xb7   : > { %1609 = vmatprep.subr.mxu1 %v2047_v1  ;;  %1611 = vmatprep.mubr.msk.f32.mxu1 %vm2046_vm0, %v2047_v1  ;;  %v1664_v7 = vpack.c.bf16 %v438_v6, %v437_v4  ;;  %v432_v8 = vld [vmem:[%s358_s19] sm:$0xff]  ;;  %s2049_s30 = smov 120   ;;  %s2050_s21 = smov 96   ;;  %vm559_vm2 = vcmask 64512   ;;  %vm1231_vm3 = vcmask 130048   ;;  %vm1233_vm4 = vcmask 195584  }
  0xb8   : > { %1662 = vmatpush3.bf16.msra.mxu0 %v1661_v5  ;;  %v2376_v12 = vld [vmem:[%s2546_s4] ss:$0 sm:$0xff]  ;;  %s2051_s18 = smov 112   ;;  %s2052_s20 = smov 64  }
  0xb9   : > { %1663 = vmatprep.subr.bf16.mxu0 %v2045_v0  ;;  %v434_v17 = vld [vmem:[%s376_s12] sm:$0xff]  ;;  %s1537_s26 = sshll.u32 %s2337_s23, 5  ;;  %s2053_s17 = smov 16  }
  0xba   : > { %s2429_s10 = scalar_lea.vmem [#allocation12], %s1537_s26  ;;  %s2054_s22 = smov 8  }
  0xbb   : > { %s2055_s3 = smov 24   ;;  %s1563_s19 = sshll.u32 %s2125_s9, 9 }
  0xbc   : > { %1665 = vmatpush3.bf16.msra.mxu0 %v1664_v7  ;;  %s1352_s13 = sshll.u32 %s2429_s10, 4  ;;  %s2460_s12 = scalar_lea.hbm %s2550_s8, %s1563_s19  ;;  %s2462_s13 = int_to_ptr.vmem [resolvable:$true] %s1352_s13 }
  0xbd   : > { %1639 = vmatprep.subr.mxu0 %v2047_v1  ;;  %s1326_s11 = scalar_lea.sflag [#allocation13], %s2337_s23  ;;  %s1930_s14 = scalar_lea.vmem %s2462_s13, 512 }
  0xbe   : > { %p1931_p6 = scmp.ne.s32.totalorder %s2462_s13, %s1930_s14  ;;  %p2598_p10 = scmp.ne.s32.totalorder %s2581_s24, 0 }
  0xbf   : > { %1601 = vmatmul.mubr.msk.f32.vlgmr.msra.gmra.mrb[0].mxu0 %vm446_vm1, %v432_v8 }
  0xc0   : > { %1603 = vmatprep.mubr.msk.f32.mxu0 %vm2046_vm0, %v2047_v1  ;;  %p1932_p8 = pnand %p1931_p6, %p2598_p10 }
  0xc2   : > { %p1933_p9 = pneg %p1932_p8 }
  0xc3   : > { %1604 = vmatmul.mubr.msk.f32.gmra.mrb[2].mxu0 %vm446_vm1, %v433_v9 }
  0xc4   : > { %1606 = vmatprep.mubr.msk.f32.mxu0 %vm2046_vm0, %v2047_v1 }
  0xc7   : > { %1607 = vmatmul.mubr.msk.f32.gmra.mrb[4].mxu0 %vm446_vm1, %v434_v17 }
  0xc8   : > { %1641 = vmatprep.mubr.msk.f32.mxu0 %vm2046_vm0, %v2047_v1 }
 0x192   : > { %v522_v10 = vpop.f32.mrb[0].mxu0 }
 0x193   : > { %v1602_v11 = vpop.f32.mrb[1].mxu0  ;;  %v523_v16 = vadd.f32 %v2376_v12, %v522_v10 }
 0x196   : > { %v527_v13 = vpop.f32.mrb[2].mxu0 }
 0x197   : > { %v528_v14 = vadd.f32 %v2376_v12, %v527_v13  ;;  %v1605_v15 = vpop.f32.mrb[3].mxu0 }
 0x199   : > { %548 = vrot.lane.b32.xlu1 %v528_v14, %s2048_s16  ;;  %544 = vrot.lane.b32.xlu0 %v528_v14, %s2049_s30 }
 0x19a   : > { %v532_v28 = vpop.f32.mrb[4].mxu0 }
 0x19b   : > { %v1608_v29 = vpop.f32.mrb[5].mxu0  ;;  %v533_v46 = vadd.f32 %v2376_v12, %v532_v28  ;;  %v1238_v28 = vld [vmem:[#allocation10 + $0x18] sm:$0xff] }
 0x19d   : > { %557 = vrot.lane.b32.xlu1 %v528_v14, %s2050_s21  ;;  %546 = vrot.lane.b32.xlu0 %v528_v14, %s2051_s18 }
 0x1a1   : > { %537 = vrot.lane.b32.xlu1 %v523_v16, %s2049_s30 }
 0x1a5   : > { %539 = vrot.lane.b32.xlu1 %v523_v16, %s2051_s18 }
 0x1a9   : > { %541 = vrot.lane.b32.xlu1 %v523_v16, %s2048_s16 }
 0x20b   : > { %v549_v18 = vpop.permute.xlu1 %548  ;;  %v545_v19 = vpop.permute.xlu0 %544 }
 0x20c   : > { %634 = vrot.lane.b32.xlu0 %v545_v19, %s2050_s21 }
 0x20f   : > { %v558_v20 = vpop.permute.xlu1 %557  ;;  %v547_v21 = vpop.permute.xlu0 %546 }
 0x210   : > { %1610 = vmatpush3.xpose.msk.msra.mxu1 %vm559_vm2, %v558_v20  ;;  %710 = vrot.lane.b32.xlu0 %v547_v21, %s2050_s21 }
 0x211   : > { %1614 = vmatprep.subr.mxu1 %v2047_v1 }
 0x213   : > { %1612 = vmatmul.mubr.msk.f32.vlgmr.msra.gmra.mrb[0].mxu1 %vm559_vm2, %v523_v16  ;;  %v538_v22 = vpop.permute.xlu1 %537 }
 0x214   : > { %786 = vrot.lane.b32.xlu0 %v549_v18, %s2050_s21  ;;  %1616 = vmatprep.mubr.msk.f32.mxu1 %vm2046_vm0, %v2047_v1 }
 0x217   : > { %v540_v25 = vpop.permute.xlu1 %539 }
 0x21b   : > { %v542_v27 = vpop.permute.xlu1 %541 }
 0x27e   : > { %v635_v23 = vpop.permute.xlu0 %634 }
 0x27f   : > { %1615 = vmatpush3.xpose.msk.msra.mxu1 %vm559_vm2, %v635_v23 }
 0x280   : > { %1619 = vmatprep.subr.mxu1 %v2047_v1 }
 0x282   : > { %1617 = vmatmul.mubr.msk.f32.vlgmr.msra.gmra.mrb[2].mxu1 %vm559_vm2, %v538_v22  ;;  %v711_v24 = vpop.permute.xlu0 %710 }
 0x283   : > { %1620 = vmatpush3.xpose.msk.msra.mxu1 %vm559_vm2, %v711_v24  ;;  %1621 = vmatprep.mubr.msk.f32.mxu1 %vm2046_vm0, %v2047_v1  ;;  %v1235_v24 = vld [vmem:[#allocation10] sm:$0xff] }
 0x284   : > { %1624 = vmatprep.subr.mxu1 %v2047_v1 }
 0x286   : > { %1622 = vmatmul.mubr.msk.f32.vlgmr.msra.gmra.mrb[4].mxu1 %vm559_vm2, %v540_v25  ;;  %v787_v26 = vpop.permute.xlu0 %786  ;;  %v1236_v25 = vld [vmem:[#allocation10 + $0x8] sm:$0xff] }
 0x287   : > { %1625 = vmatpush3.xpose.msk.msra.mxu1 %vm559_vm2, %v787_v26  ;;  %1626 = vmatprep.mubr.msk.f32.mxu1 %vm2046_vm0, %v2047_v1  ;;  %v1667_v26 = vpack.c.bf16 %v1236_v25, %v1235_v24 }
 0x288   : > { %1629 = vmatprep.subr.mxu1 %v2047_v1 }
 0x28a   : > { %1627 = vmatmul.mubr.msk.f32.vlgmr.msra.gmra.mrb[6].mxu1 %vm559_vm2, %v542_v27  ;;  %v1237_v27 = vld [vmem:[#allocation10 + $0x10] sm:$0xff] }
 0x28b   : > { %1631 = vmatprep.mubr.msk.f32.mxu1 %vm2046_vm0, %v2047_v1  ;;  %v1670_v29 = vpack.c.bf16 %v1238_v28, %v1237_v27 }
 0x2e6   : > { %v630_v30 = vpop.f32.mrb[0].mxu1 }
 0x2e7   : > { %v862_v31 = vmul.f32 0.35355338, %v630_v30  ;;  %v1613_v32 = vpop.f32.mrb[1].mxu1 }
 0x2e9   : > { %v866_v33 = vsel %vm559_vm2, %v862_v31, -inf }
 0x2ea   : > { %867 = vmax.xlane.f32.xlu0 %v866_v33 }
 0x355   : > { %v706_v34 = vpop.f32.mrb[2].mxu1 }
 0x356   : > { %v863_v35 = vmul.f32 0.35355338, %v706_v34  ;;  %v1618_v36 = vpop.f32.mrb[3].mxu1 }
 0x358   : > { %v869_v37 = vsel %vm559_vm2, %v863_v35, -inf }
 0x359   : > { %870 = vmax.xlane.f32.xlu1 %v869_v37  ;;  %v782_v38 = vpop.f32.mrb[4].mxu1 }
 0x35a   : > { %v864_v39 = vmul.f32 0.35355338, %v782_v38  ;;  %v1623_v40 = vpop.f32.mrb[5].mxu1 }
 0x35c   : > { %v872_v41 = vsel %vm559_vm2, %v864_v39, -inf }
 0x35d   : > { %873 = vmax.xlane.f32.xlu0 %v872_v41  ;;  %v858_v42 = vpop.f32.mrb[6].mxu1 }
 0x35e   : > { %v865_v43 = vmul.f32 0.35355338, %v858_v42  ;;  %v1628_v44 = vpop.f32.mrb[7].mxu1 }
 0x360   : > { %v875_v45 = vsel %vm559_vm2, %v865_v43, -inf }
 0x361   : > { %876 = vmax.xlane.f32.xlu0 %v875_v45 }
 0x36a   : > { %551 = vrot.lane.b32.xlu1 %v533_v46, %s2049_s30 }
 0x36e   : > { %555 = vrot.lane.b32.xlu1 %v533_v46, %s2048_s16  ;;  %s2056_s16 = smov [#allocation12]  }
 0x36f   : > { %s1934_s30 = sshll.u32 %s2056_s16, 4  ;;  %s1935_s30 = int_to_ptr.vmem [resolvable:$false] %s1934_s30 }
 0x370   : > { %s1936_s21 = scalar_lea.vmem %s1935_s30, 1024  ;;  %p1937_p11 = scmp.lt.s32.totalorder %s2462_s13, %s1935_s30 }
 0x371   : > { %p1938_p4 = scmp.lt.s32.totalorder %s1936_s21, %s1930_s14 }
 0x373   : > { %p1939_p13 = por %p1938_p4, %p1937_p11 }
 0x375   : > { %p1940_p2 = pnand %p1939_p13, %p1933_p9 }
 0x377   : > { %553 = vrot.lane.b32.xlu0 %v533_v46, %s2051_s18  ;;  %v868_v47 = vpop.xlane.xlu0 %867 }
 0x378   : > { %v878_v61 = vsub.f32 %v862_v31, %v868_v47 }
 0x37a   : > { %v882_v63 = vmul.f32 1.442695, %v878_v61 }
 0x37b   : > { %914 = vrot.lane.b32.xlu0 %v533_v46, %s2052_s20 }
 0x3e6   : > { %v871_v48 = vpop.xlane.xlu1 %870 }
 0x3e7   : > { %v879_v49 = vsub.f32 %v863_v35, %v871_v48 }
 0x3e9   : > { %v884_v50 = vmul.f32 1.442695, %v879_v49 }
 0x3ea   : > { %v874_v51 = vpop.xlane.xlu0 %873  ;;  %v552_v52 = vpop.permute.xlu1 %551 }
 0x3eb   : > { %1768 = vpow2.f32 %v884_v50  ;;  %v880_v53 = vsub.f32 %v864_v39, %v874_v51  ;;  %990 = vrot.lane.b32.xlu1 %v552_v52, %s2052_s20 }
 0x3ed   : > { %v886_v54 = vmul.f32 1.442695, %v880_v53 }
 0x3ee   : > { %v877_v55 = vpop.xlane.xlu0 %876  ;;  %v556_v7 = vpop.permute.xlu1 %555 }
 0x3ef   : > { %1770 = vpow2.f32 %v886_v54  ;;  %v881_v2 = vsub.f32 %v865_v43, %v877_v55 }
 0x3f0   : > { %1772 = vpow2.f32 %v882_v63 }
 0x3f1   : > { %v888_v3 = vmul.f32 1.442695, %v881_v2 }
 0x3f2   : > { %v554_v56 = vpop.permute.xlu0 %553 }
 0x3f3   : > { %1774 = vpow2.f32 %v888_v3 }
 0x3f5   : > { %v1769_v57 = vpop.eup %1768 }
 0x3f6   : > { %v915_v58 = vpop.permute.xlu0 %914  ;;  %v893_v59 = vsel %vm559_vm2, %v1769_v57, 0.0 }
 0x3f7   : > { %894 = vadd.xlane.f32.xlu0 %v893_v59  ;;  %1630 = vmatpush3.msra.mxu1 %v915_v58 }
 0x3f8   : > { %1634 = vmatprep.subr.mxu1 %v2047_v1 }
 0x3f9   : > { %v1771_v60 = vpop.eup %1770 }
 0x3fa   : > { %v896_v62 = vsel %vm559_vm2, %v1771_v60, 0.0  ;;  %v1773_v4 = vpop.eup %1772 }
 0x3fb   : > { %897 = vadd.xlane.f32.xlu0 %v896_v62  ;;  %v890_v5 = vsel %vm559_vm2, %v1773_v4, 0.0 }
 0x3fd   : > { %v1775_v6 = vpop.eup %1774 }
 0x3fe   : > { %v899_v8 = vsel %vm559_vm2, %v1775_v6, 0.0 }
 0x40f   : > { %891 = vadd.xlane.f32.xlu1 %v890_v5 }
 0x411   : > { %1142 = vrot.lane.b32.xlu0 %v556_v7, %s2052_s20 }
 0x413   : > { %900 = vadd.xlane.f32.xlu1 %v899_v8 }
 0x424   : > { %1066 = vrot.lane.b32.xlu1 %v554_v56, %s2052_s20 }
 0x45d   : > { %v991_v15 = vpop.permute.xlu1 %990 }
 0x484   : > { %v895_v9 = vpop.xlane.xlu0 %894 }
 0x485   : > { %1776 = vrcp.f32 %v895_v9 }
 0x488   : > { %v898_v10 = vpop.xlane.xlu0 %897 }
 0x489   : > { %1778 = vrcp.f32 %v898_v10 }
 0x48c   : > { %v1143_v23 = vpop.permute.xlu0 %1142 }
 0x48f   : > { %v1777_v11 = vpop.eup %1776 }
 0x490   : > { %v905_v12 = vmul.f32 %v1777_v11, %v1769_v57 }
 0x492   : > { %911 = vst.msk [vmem:[%s2429_s10 + $0x8] sm:$0xff] %vm559_vm2, %v905_v12 }
 0x493   : > { %v1779_v13 = vpop.eup %1778 }
 0x494   : > { %v907_v14 = vmul.f32 %v1779_v13, %v1771_v60 }
 0x496   : > { %912 = vst.msk [vmem:[%s2429_s10 + $0x10] sm:$0xff] %vm559_vm2, %v907_v14 }
 0x49c   : > { %v892_v16 = vpop.xlane.xlu1 %891 }
 0x49d   : > { %1780 = vrcp.f32 %v892_v16 }
 0x4a0   : > { %v901_v17 = vpop.xlane.xlu1 %900 }
 0x4a1   : > { %1782 = vrcp.f32 %v901_v17 }
 0x4a4   : > { %v1067_v18 = vpop.permute.xlu1 %1066 }
 0x4a5   : > { %1640 = vmatpush3.msra.mxu0 %v1067_v18 }
 0x4a6   : > { %1642 = vmatmul.mubr.msk.f32.vlgmr.msra.gmra.mrb[6].mxu0 %vm559_vm2, %v907_v14  ;;  %1666 = vmatprep.subr.bf16.mxu0 %v2045_v0 }
 0x4a7   : > { %v1781_v19 = vpop.eup %1780  ;;  %1657 = vmatprep.mubr.msk.f32.mxu0 %vm2046_vm0, %v2047_v1  ;;  %1668 = vmatpush3.bf16.msra.mxu0 %v1667_v26 }
 0x4a8   : > { %v903_v20 = vmul.f32 %v1781_v19, %v1773_v4  ;;  %1669 = vmatprep.subr.bf16.mxu0 %v2045_v0 }
 0x4aa   : > { %910 = vst.msk [vmem:[%s2429_s10] sm:$0xff] %vm559_vm2, %v903_v20  ;;  %1632 = vmatmul.mubr.msk.f32.vlgmr.msra.gmra.mrb[8].mxu1 %vm559_vm2, %v903_v20 }
 0x4ab   : > { %v1783_v21 = vpop.eup %1782  ;;  %1635 = vmatpush3.msra.mxu1 %v991_v15  ;;  %1636 = vmatprep.mubr.msk.f32.mxu1 %vm2046_vm0, %v2047_v1 }
 0x4ac   : > { %v909_v22 = vmul.f32 %v1783_v21, %v1775_v6  ;;  %1644 = vmatprep.subr.mxu1 %v2047_v1  ;;  %1671 = vmatpush3.bf16.msra.mxu0 %v1670_v29 }
 0x4ae   : > { %913 = vst.msk [vmem:[%s2429_s10 + $0x18] sm:$0xff] %vm559_vm2, %v909_v22  ;;  %1637 = vmatmul.mubr.msk.f32.vlgmr.msra.gmra.mrb[10].mxu1 %vm559_vm2, %v905_v12 }
 0x4af   : > { %1645 = vmatpush3.msra.mxu1 %v1143_v23  ;;  %1646 = vmatprep.mubr.msk.f32.mxu1 %vm2046_vm0, %v2047_v1 }
 0x4b2   : > { %1647 = vmatmul.mubr.msk.f32.vlgmr.msra.gmra.mrb[12].mxu1 %vm559_vm2, %v909_v22 }
 0x579   : > { %v1138_v30 = vpop.f32.mrb[6].mxu0 }
 0x57a   : > { %1223 = vrot.lane.b32.xlu0 %v1138_v30, %s2053_s17  ;;  %v1643_v31 = vpop.f32.mrb[7].mxu0 }
 0x57d   : > { %v986_v32 = vpop.f32.mrb[8].mxu1 }
 0x57e   : > { %v1633_v33 = vpop.f32.mrb[9].mxu1 }
 0x581   : > { %v1062_v34 = vpop.f32.mrb[10].mxu1 }
 0x582   : > { %1219 = vrot.lane.b32.xlu1 %v1062_v34, %s2054_s22  ;;  %v1638_v1 = vpop.f32.mrb[11].mxu1 }
 0x585   : > { %v1214_v35 = vpop.f32.mrb[12].mxu1 }
 0x586   : > { %1227 = vrot.lane.b32.xlu1 %v1214_v35, %s2055_s3  ;;  %v1648_v0 = vpop.f32.mrb[13].mxu1 }
 0x5ec   : > { %v1224_v38 = vpop.permute.xlu0 %1223 }
 0x5f4   : > { %v1220_v36 = vpop.permute.xlu1 %1219 }
 0x5f5   : > { %v1230_v37 = vsel %vm559_vm2, %v986_v32, %v1220_v36 }
 0x5f6   : > { %v1232_v40 = vsel %vm1231_vm3, %v1230_v37, %v1224_v38 }
 0x5f8   : > { %v1228_v39 = vpop.permute.xlu1 %1227 }
 0x5f9   : > { %v1234_v41 = vsel %vm1233_vm4, %v1232_v40, %v1228_v39 }
 0x5fa   : > { %1658 = vmatmul.mubr.msk.f32.vlgmr.msra.gmra.mrb[8].mxu0 %vm446_vm1, %v1234_v41 }
 0x5fb   : > { %1943 = shalt.err (!%p1940_p2)
}
 0x5fc   : > { %s1944_s18 = scalar_lea.hbm %s2460_s12, 512  ;;  %s1948_s10 = scalar_lea.hbm %s2550_s8, 1024 }
 0x5fd   : > { %p1945_p5 = scmp.ne.s32.totalorder %s2460_s12, %s1944_s18  ;;  %p1949_p0 = scmp.lt.u32.totalorder %s2460_s12, %s2550_s8 }
 0x5fe   : > { %p1950_p7 = scmp.lt.u32.totalorder %s1948_s10, %s1944_s18  ;;  %p1952_p6 = scmp.lt.u32.totalorder %s1944_s18, %s2460_s12 }
 0x5ff   : > { %p1946_p12 = pnand %p1945_p5, %p2598_p10 }
 0x600   : > { %p1951_p1 = por %p1950_p7, %p1949_p0 }
 0x601   : > { %p1947_p3 = pneg %p1946_p12 }
 0x602   : > { %p1953_p8 = por %p1952_p6, %p1951_p1 }
 0x604   : > { %p1954_p9 = pnand %p1953_p8, %p1947_p3 }
 0x606   : > { %1957 = shalt.err (!%p1954_p9)
}
 0x607   : > { %s2057_s19 = smov 128   ;;  %v1554_v42 = vld [vmem:[%s2548_s6] ss:$0 sm:$0xff]  ;;  %s1558_s14 = sshll.u32 %s2125_s9, 7 }
 0x608   : > { %1687 = dma.vmem_to_hbm [thread:$0]  (%p2598_p10), %s2462_s13, 512, %s2460_s12, %s1326_s11, %s2057_s19, %s2057_s19, %s2054_s22  }
 0x609   : > { %s424_s16 = scalar_lea.vmem [#allocation11], %s2340_s1  ;;  %s2497_s20 = scalar_lea.hbm %s2549_s7, %s1558_s14 }
 0x60a   : > { %s1339_s30 = sshll.u32 %s424_s16, 4  ;;  %s1321_s22 = scalar_lea.sflag [#allocation4], %s2337_s23  ;;  %s2499_s30 = int_to_ptr.vmem [resolvable:$true] %s1339_s30 }
 0x60b   : > { %s1958_s13 = scalar_lea.vmem %s2499_s30, 128  ;;  %s2058_s9 = smov [#allocation11]  }
 0x60c   : > { %p1959_p11 = scmp.ne.s32.totalorder %s2499_s30, %s1958_s13  ;;  %s1962_s1 = sshll.u32 %s2058_s9, 4  ;;  %s1963_s1 = int_to_ptr.vmem [resolvable:$false] %s1962_s1 }
 0x60d   : > { %s1964_s12 = scalar_lea.vmem %s1963_s1, 256  ;;  %p1965_p2 = scmp.lt.s32.totalorder %s2499_s30, %s1963_s1 }
 0x60e   : > { %p1960_p4 = pnand %p1959_p11, %p2598_p10  ;;  %p1966_p5 = scmp.lt.s32.totalorder %s1964_s12, %s1958_s13 }
 0x610   : > { %p1961_p13 = pneg %p1960_p4  ;;  %p1967_p12 = por %p1966_p5, %p1965_p2 }
 0x612   : > { %p1968_p3 = pnand %p1967_p12, %p1961_p13 }
 0x6cd   : > { %v1315_v43 = vpop.f32.mrb[8].mxu0 }
 0x6ce   : > { %v1316_v44 = vadd.f32 %v1554_v42, %v1315_v43  ;;  %v1659_v45 = vpop.f32.mrb[9].mxu0 }
 0x6d0   : > { %1319 = vst.msk [vmem:[%s424_s16] sm:$0xff] %vm446_vm1, %v1316_v44 }
 0x6d1   : > { %1971 = shalt.err (!%p1968_p3)
}
 0x6d2   : > { %s1972_s23 = scalar_lea.hbm %s2497_s20, 128  ;;  %s1976_s10 = scalar_lea.hbm %s2549_s7, 256 }
 0x6d3   : > { %p1973_p0 = scmp.ne.s32.totalorder %s2497_s20, %s1972_s23  ;;  %p1977_p6 = scmp.lt.u32.totalorder %s2497_s20, %s2549_s7 }
 0x6d4   : > { %p1978_p8 = scmp.lt.u32.totalorder %s1976_s10, %s1972_s23  ;;  %p1980_p11 = scmp.lt.u32.totalorder %s1972_s23, %s2497_s20 }
 0x6d5   : > { %p1974_p7 = pnand %p1973_p0, %p2598_p10 }
 0x6d6   : > { %p1979_p9 = por %p1978_p8, %p1977_p6 }
 0x6d7   : > { %p1975_p1 = pneg %p1974_p7 }
 0x6d8   : > { %p1981_p4 = por %p1980_p11, %p1979_p9 }
 0x6da   : > { %p1982_p13 = pnand %p1981_p4, %p1975_p1 }
 0x6dc   : > { %1985 = shalt.err (!%p1982_p13)
}
 0x6dd   : > { %1686 = dma.vmem_to_hbm [thread:$0]  (%p2598_p10), %s2499_s30, 128, %s2497_s20, %s1321_s22  }
 0x6de PF: > { %s2599_s19 = sld [smem:[#allocation20_spill]]  ;;  %s2600_s25 = sld [smem:[#allocation19_spill]] }
 0x6df   : > { %s1367_s15 = sand.u32 1, %s2024_s27  }
 0x6e0   : > { %s1368_s14 = scalar_lea.sflag [#allocation4], %s1367_s15 }
 0x6e4   : > { %p2601_p2 = scmp.ne.s32.totalorder %s2599_s19, 0  ;;  %p2602_p5 = scmp.ge.s32.totalorder %s2600_s25, 2 }
 0x6e6   : > { %p1708_p12 = pnand %p2602_p5, %p2601_p2 }
 0x6e8   : > { %2015 = dma.done.wait (!%p1708_p12), %s1368_s14, 128  }
 0x6e9   : > { %2017 = vsyncadd (!%p1708_p12), %s1368_s14, 4294967168  ;;  %s1377_s16 = scalar_lea.sflag [#allocation13], %s1367_s15 }
 0x6ea   : > { %2019 = dma.done.wait (!%p1708_p12), %s1377_s16, 512  }
 0x6eb   : > { %2021 = vsyncadd (!%p1708_p12), %s1377_s16, 4294966784  ;;  %s2603_s30 = sld [smem:[#allocation21_spill]]  ;;  %s2604_s24 = sld [smem:[#allocation22_spill]] }
 0x6ec   : > { %s2605_s27 = smov %s2028_s28  ;;  %s2606_s28 = smov %s2032_s29 }
 0x6f1   : > { %p29_p10 = scmp.ge.s32.totalorder %s2603_s30, 4   ;;  %s2607_s29 = smov %s2604_s24 }
 0x6f3   :  { %31 = sbr.rel (!%p29_p10) target bundleno = 13 (0xd), region = 142 }
 0x6fa   :  { %1382 = vsyncpa [#allocation3], 1 }
 0x6fb   :  { %1384 = vsyncpa [#allocation3 + $0x1], 1 }
 0x6fc   :  { %1385 = vsyncpa [#allocation6], 1 }
 0x6fd   :  { %1387 = vsyncpa [#allocation6 + $0x1], 1 }
 0x6fe   :  { %1388 = vsyncpa [#allocation9], 1 }
 0x6ff   :  { %1389 = vsyncpa [#allocation4], 1 }
 0x700   :  { %1391 = vsyncpa [#allocation4 + $0x1], 1 }
 0x701   :  { %1392 = vsyncpa [#allocation13], 1 }
 0x702   :  { %1394 = vsyncpa [#allocation13 + $0x1], 1 }

</bundles_post_ra>
